<compile_context>
chip_gen: v7x
topology: tpu7x:2x2x1
jax: 0.10.0
libtpu: 0.0.40
codegen_flags: <defaults>
</compile_context>

<pallas_src>
import functools

import jax
import jax.numpy as jnp
from jax import lax
from jax.experimental import pallas as pl
from jax.experimental.pallas import tpu as pltpu

BN_EPS = 1e-5


# --------------------------------------------------------------------------- #
# Kernel
# --------------------------------------------------------------------------- #
def _conv_tran_block_kernel(x_ref, lh_ref, rh_ref, w1_ref, b1_ref, w2_ref, b2_ref,
                            *rest, stride, lout, has_proj):
    """Fused conv1(k3,s)+bn1+relu -> conv2(k3,1)+bn2 -> (+shortcut) -> relu.

    x_ref  : (bb, lin, cin)  main input rows of this (batch, L) tile
    lh_ref : (bb, hl, cin)   left halo rows (zero only at the true left edge)
    rh_ref : (bb, hr, cin)   right halo rows (zero only at the true right edge)
    w1_ref : (3, cin, cout)  conv1 taps, BN1 scale folded in
    w2_ref : (3, cout, cout) conv2 taps, BN2 scale folded in
    wsc_ref: (cin, cout)     1x1 projection shortcut (only if has_proj)
    b*_ref : (1, cout)       folded BatchNorm biases (f32)
    out_ref: (bb, lt, cout)
    """
    if has_proj:
        wsc_ref, bsc_ref, out_ref = rest
    else:
        (out_ref,) = rest

    bb, lt, cout = out_ref.shape
    lt2 = lt + 2                                   # h rows needed incl. conv2 halo
    cin = x_ref.shape[-1]
    j = pl.program_id(1)

    x_blk = x_ref[...]
    # Window = rows [stride*j*lt - (stride+1), ...) of the (zero-padded) input,
    # so every conv1 tap below is a plain (strided) sublane slice.
    x_win = jnp.concatenate([lh_ref[...], x_blk, rh_ref[...]], axis=1)

    # ---- conv1 (k=3, stride s) + folded BN1 + ReLU: tap-decomposed matmuls ----
    def conv1_tap(k):
        stop = k + stride * (lt2 - 1) + 1
        return x_win[:, k:stop:stride, :].reshape(bb * lt2, cin)

    h = jnp.dot(conv1_tap(0), w1_ref[0], preferred_element_type=jnp.float32)
    h = h + jnp.dot(conv1_tap(1), w1_ref[1], preferred_element_type=jnp.float32)
    h = h + jnp.dot(conv1_tap(2), w1_ref[2], preferred_element_type=jnp.float32)
    h = jnp.maximum(h + b1_ref[...], 0.0).reshape(bb, lt2, cout)

    # conv2 zero-padding: h rows whose GLOBAL position falls outside [0, lout)
    # must be exactly zero (true sequence edges only, never interior tile edges).
    pos = j * lt - 1 + lax.broadcasted_iota(jnp.int32, (1, lt2, 1), 1)
    h = jnp.where((pos >= 0) & (pos < lout), h, 0.0)
    h = h.astype(x_blk.dtype)                      # MXU operands in compute dtype

    # ---- conv2 (k=3, stride 1) + folded BN2: tap-decomposed, no shifts needed ----
    def conv2_tap(k):
        return h[:, k:k + lt, :].reshape(bb * lt, cout)

    o = jnp.dot(conv2_tap(0), w2_ref[0], preferred_element_type=jnp.float32)
    o = o + jnp.dot(conv2_tap(1), w2_ref[1], preferred_element_type=jnp.float32)
    o = o + jnp.dot(conv2_tap(2), w2_ref[2], preferred_element_type=jnp.float32)
    o = o + b2_ref[...]

    # ---- shortcut: 1x1 projection conv + folded BN, or identity ----
    if stride == 1:
        sc_rows = x_blk
    else:
        sc_rows = x_blk[:, ::stride, :][:, :lt, :]         # center tap x[s*i]
    if has_proj:
        sc = jnp.dot(sc_rows.reshape(bb * lt, cin), wsc_ref[...],
                     preferred_element_type=jnp.float32) + bsc_ref[...]
    else:
        # TODO(synk): identity residual is added at compute_dtype precision on the
        #             bf16 fast path (x is fed to the kernel directly in bf16).
        sc = sc_rows.reshape(bb * lt, cout).astype(jnp.float32)

    out = jnp.maximum(o + sc, 0.0).reshape(bb, lt, cout)
    out_ref[...] = out.astype(out_ref.dtype)


# --------------------------------------------------------------------------- #
# Wrapper helpers
# --------------------------------------------------------------------------- #
def _fold_bn(bn, cout):
    gamma, beta, mean, var = bn
    scale = gamma / jnp.sqrt(var + BN_EPS)
    bias = (beta - mean * scale).reshape(1, cout).astype(jnp.float32)
    return scale, bias


def _divisors(n):
    return [d for d in range(1, n + 1) if n % d == 0]


def _vmem_capacity_bytes():
    try:
        info = pltpu.get_tpu_info()
        cap = getattr(info, "vmem_capacity_bytes", None)
        if cap:
            return int(cap)
    except Exception:
        pass
    return 64 * 1024 * 1024        # conservative: v7x physical VMEM per TensorCore


def _step_vmem_bytes(bb, lt, lin, cin, cout, stride, cbytes, obytes, has_proj):
    """Rough per-grid-step VMEM footprint (double-buffered blocks + intermediates)."""
    lt2 = lt + 2
    hl, hr = stride + 1, 3
    wx = hl + lin + hr
    blocks = 2 * bb * (lin + hl + hr) * cin * cbytes       # x + halo blocks
    blocks += 2 * bb * lt * cout * obytes                  # output block
    weights = (3 * cin + 3 * cout + (cin if has_proj else 0)) * cout * cbytes + 3 * cout * 4
    interm = (bb * wx * cin * cbytes                       # assembled window
              + 3 * bb * lt2 * cin * cbytes                # conv1 tap operands
              + bb * lt2 * cout * (4 + cbytes)             # h f32 + compute-dtype copy
              + 3 * bb * lt * cout * cbytes                # conv2 tap operands
              + 3 * bb * lt * cout * 4)                    # o / shortcut / staging f32
    return blocks + weights + interm


def _pick_tiles(B, L, lout, cin, cout, stride, cbytes, obytes, has_proj,
                budget_bytes, target_rows=2048):
    """Pick (batch block bb, output-L tile lt): biggest MXU M per step that fits
    the per-generation VMEM budget, preferring >=2 grid steps (v7x megacore)."""
    can_tile_l = (stride * lout == L)
    fitting, fallback = [], []
    for bb in _divisors(B):
        for lt in _divisors(lout):
            if lt != lout and not (can_tile_l and lt % 8 == 0):
                continue                            # L blocks must be 8-row aligned
            lin = stride * lt if lt != lout else L
            est = _step_vmem_bytes(bb, lt, lin, cin, cout, stride, cbytes, obytes,
                                   has_proj)
            steps = (B // bb) * (lout // lt)
            rows = bb * lt
            key = (int(steps >= 2), min(rows, target_rows), rows, lout // lt)
            fallback.append((est, bb, lt))
            if est <= budget_bytes:
                fitting.append((key, bb, lt))
    if fitting:
        _, bb, lt = max(fitting)
    else:                                            # nothing fits: smallest footprint
        _, bb, lt = min(fallback)
    return bb, lt


def _const_spec(shape):
    """Weight/bias operand whose block index never changes -> single-buffered."""
    index_map = lambda *_: (0,) * len(shape)
    try:
        return pl.BlockSpec(shape, index_map, pipeline_mode=pl.Buffered(1))
    except TypeError:   # older JAX without pipeline_mode on BlockSpec
        return pl.BlockSpec(shape, index_map)


# --------------------------------------------------------------------------- #
# Public entry point (channels-last / NLC native)
# --------------------------------------------------------------------------- #
def conv_tran_block_pallas(x, params, stride=1, compute_dtype=jnp.bfloat16,
                           out_dtype=None):
    """Fused ConvTranBlock forward.

    x: (B, L, Cin) channels-last; any float dtype (bf16 recommended — fed to the
       MXU directly, no extra casts/copies). Returns (B, Lout, Cout) channels-last
       in `out_dtype` (default: compute_dtype). Keep activations NLC across
       stacked blocks; convert layout only at the model boundary.
    """
    if out_dtype is None:
        out_dtype = compute_dtype
    B, L, cin = x.shape
    cout = params["w1"].shape[0]
    lout = (L - 1) // stride + 1
    has_proj = params["wsc"] is not None

    x = x.astype(compute_dtype)                    # no-op if caller already feeds bf16

    # Fold BatchNorm scales into the conv weights; only biases reach the kernel.
    s1, b1 = _fold_bn(params["bn1"], cout)
    s2, b2 = _fold_bn(params["bn2"], cout)
    w1 = (jnp.transpose(params["w1"], (2, 1, 0)) * s1[None, None, :]).astype(compute_dtype)
    w2 = (jnp.transpose(params["w2"], (2, 1, 0)) * s2[None, None, :]).astype(compute_dtype)

    # Per-generation VMEM budgeting (v5e/v6e 128 MiB, v7x 64 MiB physical).
    cbytes = jnp.dtype(compute_dtype).itemsize
    obytes = jnp.dtype(out_dtype).itemsize
    vmem_cap = _vmem_capacity_bytes()
    vmem_limit = min((vmem_cap * 3) // 4, 100 * 1024 * 1024)
    bb, lt = _pick_tiles(B, L, lout, cin, cout, stride, cbytes, obytes, has_proj,
                         budget_bytes=(vmem_limit * 4) // 5)
    nl = lout // lt
    lin = stride * lt if nl > 1 else L
    hl = stride + 1                                          # left halo rows
    hr = stride * lt + stride + 3 - hl - lin                 # 2 when L-tiled

    # Tiny per-tile halo slabs (2-3 rows each) so the main x blocks stay
    # non-overlapping and auto-pipelined; zeros only at true sequence edges.
    if nl > 1:
        xt = x.reshape(B, nl, lin, cin)
        lh = jnp.concatenate(
            [jnp.zeros((B, 1, hl, cin), x.dtype), xt[:, :-1, lin - hl:, :]], axis=1)
        rh = jnp.concatenate(
            [xt[:, 1:, :hr, :], jnp.zeros((B, 1, hr, cin), x.dtype)], axis=1)
    else:
        lh = jnp.zeros((B, 1, hl, cin), x.dtype)
        rh = jnp.zeros((B, 1, hr, cin), x.dtype)

    inputs = [x, lh, rh, w1, b1, w2, b2]
    in_specs = [
        pl.BlockSpec((bb, lin, cin), lambda b, j: (b, j, 0)),
        pl.BlockSpec((bb, None, hl, cin), lambda b, j: (b, j, 0, 0)),
        pl.BlockSpec((bb, None, hr, cin), lambda b, j: (b, j, 0, 0)),
        _const_spec((3, cin, cout)),
        _const_spec((1, cout)),
        _const_spec((3, cout, cout)),
        _const_spec((1, cout)),
    ]
    if has_proj:
        ssc, bsc = _fold_bn(params["bnsc"], cout)
        wsc = (jnp.transpose(params["wsc"][:, :, 0], (1, 0))
               * ssc[None, :]).astype(compute_dtype)
        inputs += [wsc, bsc]
        in_specs += [_const_spec((cin, cout)), _const_spec((1, cout))]

    kernel = functools.partial(_conv_tran_block_kernel,
                               stride=stride, lout=lout, has_proj=has_proj)

    return pl.pallas_call(
        kernel,
        out_shape=jax.ShapeDtypeStruct((B, lout, cout), out_dtype),
        grid=(B // bb, nl),
        in_specs=in_specs,
        out_specs=pl.BlockSpec((bb, lt, cout), lambda b, j: (b, j, 0)),
        compiler_params=pltpu.CompilerParams(
            dimension_semantics=("parallel", "parallel"),   # megacore sharding on v7x
            vmem_limit_bytes=int(vmem_limit)),
    )(*inputs)


# --------------------------------------------------------------------------- #
# Synthetic params + pure-JAX reference (PyTorch NCL semantics)
# --------------------------------------------------------------------------- #
def make_params(key, cin, cout, stride):
    """Deterministic synthetic parameters (PyTorch shapes: Conv1d weight = (Cout, Cin, k))."""
    ks = jax.random.split(key, 6)

    def bn_params(k):
        k1, k2, k3, k4 = jax.random.split(k, 4)
        gamma = jax.random.uniform(k1, (cout,), jnp.float32, 0.5, 1.5)
        beta = jax.random.normal(k2, (cout,), jnp.float32) * 0.1
        mean = jax.random.normal(k3, (cout,), jnp.float32) * 0.1
        var = jax.random.uniform(k4, (cout,), jnp.float32, 0.5, 1.5)
        return gamma, beta, mean, var

    params = dict(
        w1=jax.random.normal(ks[0], (cout, cin, 3), jnp.float32) * 0.3,
        w2=jax.random.normal(ks[1], (cout, cout, 3), jnp.float32) * 0.3,
        bn1=bn_params(ks[2]),
        bn2=bn_params(ks[3]),
        wsc=None,
        bnsc=None,
    )
    if stride != 1 or cin != cout:
        params["wsc"] = jax.random.normal(ks[4], (cout, cin, 1), jnp.float32) * 0.3
        params["bnsc"] = bn_params(ks[5])
    return params


def conv_tran_block_ref(x, params, stride=1):
    """Pure-JAX f32 reference (eval-mode BN), NCL layout like PyTorch."""
    def conv1d(x, w, s, p):
        return lax.conv_general_dilated(
            x, w, window_strides=(s,), padding=[(p, p)],
            dimension_numbers=("NCH", "OIH", "NCH"))

    def bn(x, bnp):
        gamma, beta, mean, var = bnp
        inv = gamma / jnp.sqrt(var + BN_EPS)
        return (x - mean[None, :, None]) * inv[None, :, None] + beta[None, :, None]

    out = jax.nn.relu(bn(conv1d(x, params["w1"], stride, 1), params["bn1"]))
    out = bn(conv1d(out, params["w2"], 1, 1), params["bn2"])
    if params["wsc"] is not None:
        sc = bn(conv1d(x, params["wsc"], stride, 0), params["bnsc"])
    else:
        sc = x
    return jax.nn.relu(out + sc)


# --------------------------------------------------------------------------- #
# Self-test
# --------------------------------------------------------------------------- #
if __name__ == "__main__":
    key = jax.random.PRNGKey(0)
    kx1, kx2, kx3, kp1, kp2, kp3 = jax.random.split(key, 6)

    def check(x_ncl, params, stride, compute_dtype, tol):
        # Model-boundary layout change only: the Pallas block itself is NLC-native,
        # so a stack of these blocks keeps activations NLC (and bf16) end to end.
        x_nlc = jnp.transpose(x_ncl, (0, 2, 1)).astype(compute_dtype)
        y_nlc = jax.block_until_ready(
            conv_tran_block_pallas(x_nlc, params, stride=stride,
                                   compute_dtype=compute_dtype))
        y = jnp.transpose(y_nlc, (0, 2, 1)).astype(jnp.float32)   # back to NCL for the check
        y_ref = conv_tran_block_ref(x_ncl, params, stride=stride)
        assert y.shape == y_ref.shape, (y.shape, y_ref.shape)
        err = float(jnp.max(jnp.abs(y - y_ref)))
        scale = max(1.0, float(jnp.max(jnp.abs(y_ref))))
        assert err <= tol * scale, (str(compute_dtype), stride, err, scale)

    TOL_F32 = 2e-4   # f32 path: validates the kernel math tightly
    TOL_BF16 = 8e-2  # bf16 MXU fast path (bf16 in/out) vs f32 reference

    # Config A: projection shortcut (cin != cout), stride=1 (exercises L tiling + halo).
    B, Cin, Cout, L = 2, 4, 8, 16
    x = jax.random.normal(kx1, (B, Cin, L), jnp.float32)
    p = make_params(kp1, Cin, Cout, stride=1)
    check(x, p, 1, jnp.float32, TOL_F32)
    check(x, p, 1, jnp.bfloat16, TOL_BF16)

    # Config B: identity shortcut (cin == cout), stride=1 — no shortcut matmul.
    x2 = jax.random.normal(kx2, (B, Cout, L), jnp.float32)
    p2 = make_params(kp2, Cout, Cout, stride=1)
    check(x2, p2, 1, jnp.float32, TOL_F32)
    check(x2, p2, 1, jnp.bfloat16, TOL_BF16)

    # Config C: projection shortcut with stride=2 (downsampling block, strided taps).
    x3 = jax.random.normal(kx3, (B, Cin, L), jnp.float32)
    p3 = make_params(kp3, Cin, Cout, stride=2)
    check(x3, p3, 2, jnp.float32, TOL_F32)
    check(x3, p3, 2, jnp.bfloat16, TOL_BF16)

    print("KERNEL_OK")
</pallas_src>

<mosaic_0001>
module attributes {stable_mosaic.version = 11 : i64} {
  func.func @_conv_tran_block_kernel(%arg0: i32, %arg1: i32, %arg2: memref<2x8x4xf32, #tpu.memory_space<vmem>>, %arg3: memref<2x1x2x4xf32, #tpu.memory_space<vmem>>, %arg4: memref<2x1x2x4xf32, #tpu.memory_space<vmem>>, %arg5: memref<3x4x8xf32, #tpu.memory_space<vmem>>, %arg6: memref<1x8xf32, #tpu.memory_space<vmem>>, %arg7: memref<3x8x8xf32, #tpu.memory_space<vmem>>, %arg8: memref<1x8xf32, #tpu.memory_space<vmem>>, %arg9: memref<4x8xf32, #tpu.memory_space<vmem>>, %arg10: memref<1x8xf32, #tpu.memory_space<vmem>>, %arg11: memref<2x8x8xf32, #tpu.memory_space<vmem>>) attributes {dimension_semantics = [#tpu.dimension_semantics<parallel>, #tpu.dimension_semantics<parallel>], iteration_bounds = array<i64: 1, 2>, scalar_prefetch = 0 : i64, scratch_operands = 0 : i64, tpu.core_type = #tpu.core_type<tc>, window_params = [{transform_indices = @transform_0, window_bounds = array<i64: 2, 8, 4>}, {transform_indices = @transform_1, window_bounds = array<i64: 2, 1, 2, 4>}, {transform_indices = @transform_2, window_bounds = array<i64: 2, 1, 2, 4>}, {pipeline_mode = #tpu.pipeline_mode<synchronous>, transform_indices = @transform_3, window_bounds = array<i64: 3, 4, 8>}, {pipeline_mode = #tpu.pipeline_mode<synchronous>, transform_indices = @transform_4, window_bounds = array<i64: 1, 8>}, {pipeline_mode = #tpu.pipeline_mode<synchronous>, transform_indices = @transform_5, window_bounds = array<i64: 3, 8, 8>}, {pipeline_mode = #tpu.pipeline_mode<synchronous>, transform_indices = @transform_6, window_bounds = array<i64: 1, 8>}, {pipeline_mode = #tpu.pipeline_mode<synchronous>, transform_indices = @transform_7, window_bounds = array<i64: 4, 8>}, {pipeline_mode = #tpu.pipeline_mode<synchronous>, transform_indices = @transform_8, window_bounds = array<i64: 1, 8>}, {transform_indices = @transform_9, window_bounds = array<i64: 2, 8, 8>}]} {
    %c0 = arith.constant 0 : index
    %c0_0 = arith.constant 0 : index
    %c0_1 = arith.constant 0 : index
    %0 = vector.load %arg2[%c0, %c0_0, %c0_1] : memref<2x8x4xf32, #tpu.memory_space<vmem>>, vector<2x8x4xf32>
    %c0_2 = arith.constant 0 : index
    %c0_3 = arith.constant 0 : index
    %c0_4 = arith.constant 0 : index
    %c0_5 = arith.constant 0 : index
    %1 = vector.load %arg3[%c0_2, %c0_3, %c0_4, %c0_5] : memref<2x1x2x4xf32, #tpu.memory_space<vmem>>, vector<2x1x2x4xf32>
    %2 = vector.shape_cast %1 : vector<2x1x2x4xf32> to vector<2x2x4xf32>
    %c0_6 = arith.constant 0 : index
    %c0_7 = arith.constant 0 : index
    %c0_8 = arith.constant 0 : index
    %c0_9 = arith.constant 0 : index
    %3 = vector.load %arg4[%c0_6, %c0_7, %c0_8, %c0_9] : memref<2x1x2x4xf32, #tpu.memory_space<vmem>>, vector<2x1x2x4xf32>
    %4 = vector.shape_cast %3 : vector<2x1x2x4xf32> to vector<2x2x4xf32>
    %5 = tpu.concatenate %2, %0, %4 in 1 : vector<2x2x4xf32>, vector<2x8x4xf32>, vector<2x2x4xf32> -> vector<2x12x4xf32>
    %6 = vector.extract_strided_slice %5 {offsets = [0, 0, 0], sizes = [2, 10, 4], strides = [1, 1, 1]} : vector<2x12x4xf32> to vector<2x10x4xf32>
    %7 = vector.shape_cast %6 : vector<2x10x4xf32> to vector<20x4xf32>
    %c0_10 = arith.constant 0 : index
    %c0_11 = arith.constant 0 : index
    %c0_12 = arith.constant 0 : index
    %8 = vector.load %arg5[%c0_10, %c0_11, %c0_12] : memref<3x4x8xf32, #tpu.memory_space<vmem>>, vector<1x4x8xf32>
    %9 = vector.shape_cast %8 : vector<1x4x8xf32> to vector<4x8xf32>
    %cst = arith.constant dense<0.000000e+00> : vector<20x8xf32>
    %10 = tpu.matmul %7, %9, %cst {dimension_numbers = #tpu.dot_dimension_numbers<[1], [0], [0], [1], [0, 0, 1, 1], [], []>} : vector<20x4xf32>, vector<4x8xf32>, vector<20x8xf32> -> vector<20x8xf32>
    %11 = vector.extract_strided_slice %5 {offsets = [0, 1, 0], sizes = [2, 10, 4], strides = [1, 1, 1]} : vector<2x12x4xf32> to vector<2x10x4xf32>
    %12 = vector.shape_cast %11 : vector<2x10x4xf32> to vector<20x4xf32>
    %c1 = arith.constant 1 : index
    %c0_13 = arith.constant 0 : index
    %c0_14 = arith.constant 0 : index
    %13 = vector.load %arg5[%c1, %c0_13, %c0_14] : memref<3x4x8xf32, #tpu.memory_space<vmem>>, vector<1x4x8xf32>
    %14 = vector.shape_cast %13 : vector<1x4x8xf32> to vector<4x8xf32>
    %cst_15 = arith.constant dense<0.000000e+00> : vector<20x8xf32>
    %15 = tpu.matmul %12, %14, %cst_15 {dimension_numbers = #tpu.dot_dimension_numbers<[1], [0], [0], [1], [0, 0, 1, 1], [], []>} : vector<20x4xf32>, vector<4x8xf32>, vector<20x8xf32> -> vector<20x8xf32>
    %16 = arith.addf %10, %15 : vector<20x8xf32>
    %17 = vector.extract_strided_slice %5 {offsets = [0, 2, 0], sizes = [2, 10, 4], strides = [1, 1, 1]} : vector<2x12x4xf32> to vector<2x10x4xf32>
    %18 = vector.shape_cast %17 : vector<2x10x4xf32> to vector<20x4xf32>
    %c2 = arith.constant 2 : index
    %c0_16 = arith.constant 0 : index
    %c0_17 = arith.constant 0 : index
    %19 = vector.load %arg5[%c2, %c0_16, %c0_17] : memref<3x4x8xf32, #tpu.memory_space<vmem>>, vector<1x4x8xf32>
    %20 = vector.shape_cast %19 : vector<1x4x8xf32> to vector<4x8xf32>
    %cst_18 = arith.constant dense<0.000000e+00> : vector<20x8xf32>
    %21 = tpu.matmul %18, %20, %cst_18 {dimension_numbers = #tpu.dot_dimension_numbers<[1], [0], [0], [1], [0, 0, 1, 1], [], []>} : vector<20x4xf32>, vector<4x8xf32>, vector<20x8xf32> -> vector<20x8xf32>
    %22 = arith.addf %16, %21 : vector<20x8xf32>
    %c0_19 = arith.constant 0 : index
    %c0_20 = arith.constant 0 : index
    %23 = vector.load %arg6[%c0_19, %c0_20] : memref<1x8xf32, #tpu.memory_space<vmem>>, vector<1x8xf32>
    %24 = vector.broadcast %23 : vector<1x8xf32> to vector<20x8xf32>
    %25 = arith.addf %22, %24 : vector<20x8xf32>
    %cst_21 = arith.constant 0.000000e+00 : f32
    %26 = vector.broadcast %cst_21 : f32 to vector<20x8xf32>
    %27 = arith.maximumf %25, %26 : vector<20x8xf32>
    %28 = vector.shape_cast %27 : vector<20x8xf32> to vector<2x10x8xf32>
    %c8_i32 = arith.constant 8 : i32
    %29 = arith.muli %arg1, %c8_i32 : i32
    %c1_i32 = arith.constant 1 : i32
    %30 = arith.subi %29, %c1_i32 : i32
    %31 = tpu.iota {dimensions = array<i32: 1>} : vector<1x10x1xi32>
    %32 = vector.broadcast %30 : i32 to vector<1x10x1xi32>
    %33 = arith.addi %32, %31 : vector<1x10x1xi32>
    %c0_i32 = arith.constant 0 : i32
    %34 = vector.broadcast %c0_i32 : i32 to vector<1x10x1xi32>
    %35 = arith.cmpi sge, %33, %34 : vector<1x10x1xi32>
    %c16_i32 = arith.constant 16 : i32
    %36 = vector.broadcast %c16_i32 : i32 to vector<1x10x1xi32>
    %37 = arith.cmpi slt, %33, %36 : vector<1x10x1xi32>
    %38 = arith.andi %35, %37 : vector<1x10x1xi1>
    %cst_22 = arith.constant 0.000000e+00 : f32
    %39 = vector.shape_cast %38 : vector<1x10x1xi1> to vector<1x10x1xi1>
    %40 = vector.broadcast %39 : vector<1x10x1xi1> to vector<2x10x8xi1>
    %41 = vector.broadcast %cst_22 : f32 to vector<2x10x8xf32>
    %42 = arith.select %40, %28, %41 : vector<2x10x8xi1>, vector<2x10x8xf32>
    %43 = vector.extract_strided_slice %42 {offsets = [0, 0, 0], sizes = [2, 8, 8], strides = [1, 1, 1]} : vector<2x10x8xf32> to vector<2x8x8xf32>
    %44 = vector.shape_cast %43 : vector<2x8x8xf32> to vector<16x8xf32>
    %c0_23 = arith.constant 0 : index
    %c0_24 = arith.constant 0 : index
    %c0_25 = arith.constant 0 : index
    %45 = vector.load %arg7[%c0_23, %c0_24, %c0_25] : memref<3x8x8xf32, #tpu.memory_space<vmem>>, vector<1x8x8xf32>
    %46 = vector.shape_cast %45 : vector<1x8x8xf32> to vector<8x8xf32>
    %cst_26 = arith.constant dense<0.000000e+00> : vector<16x8xf32>
    %47 = tpu.matmul %44, %46, %cst_26 {dimension_numbers = #tpu.dot_dimension_numbers<[1], [0], [0], [1], [0, 0, 1, 1], [], []>} : vector<16x8xf32>, vector<8x8xf32>, vector<16x8xf32> -> vector<16x8xf32>
    %48 = vector.extract_strided_slice %42 {offsets = [0, 1, 0], sizes = [2, 8, 8], strides = [1, 1, 1]} : vector<2x10x8xf32> to vector<2x8x8xf32>
    %49 = vector.shape_cast %48 : vector<2x8x8xf32> to vector<16x8xf32>
    %c1_27 = arith.constant 1 : index
    %c0_28 = arith.constant 0 : index
    %c0_29 = arith.constant 0 : index
    %50 = vector.load %arg7[%c1_27, %c0_28, %c0_29] : memref<3x8x8xf32, #tpu.memory_space<vmem>>, vector<1x8x8xf32>
    %51 = vector.shape_cast %50 : vector<1x8x8xf32> to vector<8x8xf32>
    %cst_30 = arith.constant dense<0.000000e+00> : vector<16x8xf32>
    %52 = tpu.matmul %49, %51, %cst_30 {dimension_numbers = #tpu.dot_dimension_numbers<[1], [0], [0], [1], [0, 0, 1, 1], [], []>} : vector<16x8xf32>, vector<8x8xf32>, vector<16x8xf32> -> vector<16x8xf32>
    %53 = arith.addf %47, %52 : vector<16x8xf32>
    %54 = vector.extract_strided_slice %42 {offsets = [0, 2, 0], sizes = [2, 8, 8], strides = [1, 1, 1]} : vector<2x10x8xf32> to vector<2x8x8xf32>
    %55 = vector.shape_cast %54 : vector<2x8x8xf32> to vector<16x8xf32>
    %c2_31 = arith.constant 2 : index
    %c0_32 = arith.constant 0 : index
    %c0_33 = arith.constant 0 : index
    %56 = vector.load %arg7[%c2_31, %c0_32, %c0_33] : memref<3x8x8xf32, #tpu.memory_space<vmem>>, vector<1x8x8xf32>
    %57 = vector.shape_cast %56 : vector<1x8x8xf32> to vector<8x8xf32>
    %cst_34 = arith.constant dense<0.000000e+00> : vector<16x8xf32>
    %58 = tpu.matmul %55, %57, %cst_34 {dimension_numbers = #tpu.dot_dimension_numbers<[1], [0], [0], [1], [0, 0, 1, 1], [], []>} : vector<16x8xf32>, vector<8x8xf32>, vector<16x8xf32> -> vector<16x8xf32>
    %59 = arith.addf %53, %58 : vector<16x8xf32>
    %c0_35 = arith.constant 0 : index
    %c0_36 = arith.constant 0 : index
    %60 = vector.load %arg8[%c0_35, %c0_36] : memref<1x8xf32, #tpu.memory_space<vmem>>, vector<1x8xf32>
    %61 = vector.broadcast %60 : vector<1x8xf32> to vector<16x8xf32>
    %62 = arith.addf %59, %61 : vector<16x8xf32>
    %63 = vector.shape_cast %0 : vector<2x8x4xf32> to vector<16x4xf32>
    %c0_37 = arith.constant 0 : index
    %c0_38 = arith.constant 0 : index
    %64 = vector.load %arg9[%c0_37, %c0_38] : memref<4x8xf32, #tpu.memory_space<vmem>>, vector<4x8xf32>
    %cst_39 = arith.constant dense<0.000000e+00> : vector<16x8xf32>
    %65 = tpu.matmul %63, %64, %cst_39 {dimension_numbers = #tpu.dot_dimension_numbers<[1], [0], [0], [1], [0, 0, 1, 1], [], []>} : vector<16x4xf32>, vector<4x8xf32>, vector<16x8xf32> -> vector<16x8xf32>
    %c0_40 = arith.constant 0 : index
    %c0_41 = arith.constant 0 : index
    %66 = vector.load %arg10[%c0_40, %c0_41] : memref<1x8xf32, #tpu.memory_space<vmem>>, vector<1x8xf32>
    %67 = vector.broadcast %66 : vector<1x8xf32> to vector<16x8xf32>
    %68 = arith.addf %65, %67 : vector<16x8xf32>
    %69 = arith.addf %62, %68 : vector<16x8xf32>
    %cst_42 = arith.constant 0.000000e+00 : f32
    %70 = vector.broadcast %cst_42 : f32 to vector<16x8xf32>
    %71 = arith.maximumf %69, %70 : vector<16x8xf32>
    %72 = vector.shape_cast %71 : vector<16x8xf32> to vector<2x8x8xf32>
    %c0_43 = arith.constant 0 : index
    %c0_44 = arith.constant 0 : index
    %c0_45 = arith.constant 0 : index
    %73 = vector.load %arg11[%c0_43, %c0_44, %c0_45] : memref<2x8x8xf32, #tpu.memory_space<vmem>>, vector<2x8x8xf32>
    tpu.vector_store %arg11[%c0_43, %c0_44, %c0_45], %72 {strides = array<i32>} : memref<2x8x8xf32, #tpu.memory_space<vmem>>, vector<2x8x8xf32>,
    return
  }
  func.func @transform_0(%arg0: i32, %arg1: i32) -> (i32, i32, i32) {
    %c0_i32 = arith.constant 0 : i32
    %c0_i32_0 = arith.constant 0 : i32
    return %arg0, %arg1, %c0_i32 : i32, i32, i32
  }
  func.func @transform_1(%arg0: i32, %arg1: i32) -> (i32, i32, i32, i32) {
    %c0_i32 = arith.constant 0 : i32
    %c0_i32_0 = arith.constant 0 : i32
    %c0_i32_1 = arith.constant 0 : i32
    return %arg0, %arg1, %c0_i32, %c0_i32_0 : i32, i32, i32, i32
  }
  func.func @transform_2(%arg0: i32, %arg1: i32) -> (i32, i32, i32, i32) {
    %c0_i32 = arith.constant 0 : i32
    %c0_i32_0 = arith.constant 0 : i32
    %c0_i32_1 = arith.constant 0 : i32
    return %arg0, %arg1, %c0_i32, %c0_i32_0 : i32, i32, i32, i32
  }
  func.func @transform_3(%arg0: i32, %arg1: i32) -> (i32, i32, i32) {
    %c0_i32 = arith.constant 0 : i32
    %c0_i32_0 = arith.constant 0 : i32
    %c0_i32_1 = arith.constant 0 : i32
    %c0_i32_2 = arith.constant 0 : i32
    return %c0_i32, %c0_i32_0, %c0_i32_1 : i32, i32, i32
  }
  func.func @transform_4(%arg0: i32, %arg1: i32) -> (i32, i32) {
    %c0_i32 = arith.constant 0 : i32
    %c0_i32_0 = arith.constant 0 : i32
    %c0_i32_1 = arith.constant 0 : i32
    return %c0_i32, %c0_i32_0 : i32, i32
  }
  func.func @transform_5(%arg0: i32, %arg1: i32) -> (i32, i32, i32) {
    %c0_i32 = arith.constant 0 : i32
    %c0_i32_0 = arith.constant 0 : i32
    %c0_i32_1 = arith.constant 0 : i32
    %c0_i32_2 = arith.constant 0 : i32
    return %c0_i32, %c0_i32_0, %c0_i32_1 : i32, i32, i32
  }
  func.func @transform_6(%arg0: i32, %arg1: i32) -> (i32, i32) {
    %c0_i32 = arith.constant 0 : i32
    %c0_i32_0 = arith.constant 0 : i32
    %c0_i32_1 = arith.constant 0 : i32
    return %c0_i32, %c0_i32_0 : i32, i32
  }
  func.func @transform_7(%arg0: i32, %arg1: i32) -> (i32, i32) {
    %c0_i32 = arith.constant 0 : i32
    %c0_i32_0 = arith.constant 0 : i32
    %c0_i32_1 = arith.constant 0 : i32
    return %c0_i32, %c0_i32_0 : i32, i32
  }
  func.func @transform_8(%arg0: i32, %arg1: i32) -> (i32, i32) {
    %c0_i32 = arith.constant 0 : i32
    %c0_i32_0 = arith.constant 0 : i32
    %c0_i32_1 = arith.constant 0 : i32
    return %c0_i32, %c0_i32_0 : i32, i32
  }
  func.func @transform_9(%arg0: i32, %arg1: i32) -> (i32, i32, i32) {
    %c0_i32 = arith.constant 0 : i32
    %c0_i32_0 = arith.constant 0 : i32
    return %arg0, %arg1, %c0_i32 : i32, i32, i32
  }
}

</mosaic_0001>

<bundles_post_ra>
// kernel: tpu_custom_call.1
= control target key start
LH: loop header
LB: loop body
LE: loop exit
PB: predicated region body
PF: predicated region fallthrough
CT: control target
= control target key end

     0   :  { %14 = vsyncpa [#allocation5], 0  ;;  %s2391_s0 = inlined_call_operand.vmem [shape: f32[2,16,4], index: 0, kind: input, shape index: {}]   ;;  %s2392_s1 = inlined_call_operand.vmem [shape: f32[2,2,2,4], index: 1, kind: input, shape index: {}]   ;;  %s2393_s2 = inlined_call_operand.hbm [shape: f32[2,2,2,4], index: 2, kind: input, shape index: {}]   ;;  %s2394_s3 = inlined_call_operand.vmem [shape: f32[3,4,8], index: 3, kind: input, shape index: {}]   ;;  %s2395_s4 = inlined_call_operand.vmem [shape: f32[1,8], index: 4, kind: input, shape index: {}]   ;;  %s2396_s5 = inlined_call_operand.vmem [shape: f32[3,8,8], index: 5, kind: input, shape index: {}]   ;;  %s2397_s6 = inlined_call_operand.vmem [shape: f32[1,8], index: 6, kind: input, shape index: {}]   ;;  %s2398_s7 = inlined_call_operand.vmem [shape: f32[4,8], index: 7, kind: input, shape index: {}]   ;;  %s2399_s8 = inlined_call_operand.vmem [shape: f32[1,8], index: 8, kind: input, shape index: {}]   ;;  %s2400_s9 = inlined_call_operand.vmem [shape: f32[2,16,8], index: 9, kind: output, shape index: {}]  }
   0x1   :  { %16 = vsyncpa [#allocation5 + $0x1], 0  ;;  %s2007_s30 = smov 0   ;;  %s2009_s10 = smov 0  }
   0x2   :  { %s2011_s11 = smov 0   ;;  %s2013_s12 = smov 0  }
   0x3   :  { %s2015_s13 = smov 0   ;;  %s2017_s14 = smov 0  }
   0x4 LB: > { %s1675_s15 = sadd.s32 4294967295, %s1948_s14   ;;  %s31_s16 = sadd.s32 1, %s1944_s13  ;;  %s1948_s14 = sphi %s2017_s14, %s22_s14   ;;  %s1944_s13 = sphi %s2015_s13, %s2420_s13   ;;  %s1940_s12 = sphi %s2013_s12, %s2419_s12   ;;  %s1936_s11 = sphi %s2011_s11, %s2418_s11   ;;  %s1932_s10 = sphi %s2009_s10, %s2417_s10   ;;  %s1928_s30 = sphi %s2007_s30, %s2416_s30  }
   0x5   : > { %p32_p0 = scmp.ge.s32.totalorder %s31_s16, 2  ;;  %s43_s17 = sadd.s32 1, %s1936_s11 }
   0x6   : > { %p50_p1 = scmp.ne.s32.totalorder %s1936_s11, %s1932_s10  ;;  %p51_p2 = scmp.eq.s32.totalorder %s1948_s14, 0 }
   0x7   : > { %s2422_s16 = smov (%p32_p0, %s31_s16), 0  ;;  %p112_p4 = scmp.ne.s32.totalorder %s1932_s10, %s1928_s30 }
   0x8   : > { %2402 = sst [smem:[#allocation8_spill]] %s2422_s16  ;;  %p2043_p3 = por %p51_p2, %p50_p1 }
   0x9   : > { %s39_s19 = ssub.s32 %s1944_s13, %s2422_s16  ;;  %p113_p5 = scmp.eq.s32.totalorder %s1675_s15, 0 }
   0xa   : > { %p41_p6 = scmp.eq.s32.totalorder %s39_s19, 0  ;;  %p264_p7 = scmp.eq.s32.totalorder %s1675_s15, 1 }
   0xb   : > { %p2050_p8 = por %p113_p5, %p112_p4  ;;  %p1678_p10 = scmp.ge.s32.totalorder %s1948_s14, 2 }
   0xc   : > { %s2055_s21 = scalar_select %p41_p6, %s1936_s11, %s43_s17  }
   0xd   : > { %p2057_p9 = por %p264_p7, %p50_p1  ;;  %304 = sbr.rel (%p1678_p10) target bundleno = 61 (0x3d), region = 40 }
   0xf   : > { %s2405_s22 = scalar_select %p2057_p9, 1, 0 }
  0x14   : > { %307 = sbr.rel (!%p2043_p3) target bundleno = 27 (0x1b), region = 44  ;;  %s309_s23 = sand.u32 (%p2043_p3), 1, %s1936_s11  }
  0x15   : > { %s1680_s24 = sshll.u32 (%p2043_p3), %s1944_s13, 3  ;;  %s1679_s25 = sshll.u32 (%p2043_p3), %s309_s23, 4 }
  0x16   : > { %s316_s28 = scalar_lea.vmem (%p2043_p3), %s2391_s0, %s1680_s24  ;;  %s311_s29 = scalar_lea.vmem (%p2043_p3), [#allocation2], %s1679_s25 }
  0x17   : > { %v346_v0 = vld [vmem:[%s316_s28] sm:$0xff] (%p2043_p3)  ;;  %v348_v1 = vld [vmem:[%s316_s28 + $0x10] sm:$0xff] (%p2043_p3) }
  0x18   : > { %347 = vst [vmem:[%s311_s29] sm:$0xff] (%p2043_p3), %v346_v0  ;;  %349 = vst [vmem:[%s311_s29 + $0x8] sm:$0xff] (%p2043_p3), %v348_v1 }
  0x1b PF: > { %355 = sbr.rel (!%p2043_p3) target bundleno = 34 (0x22), region = 82  ;;  %s357_s30 = sand.u32 (%p2043_p3), 1, %s1936_s11  }
  0x1c   : > { %s1682_s15 = sshll.u32 (%p2043_p3), %s1944_s13, 1  ;;  %s1681_s17 = sshll.u32 (%p2043_p3), %s357_s30, 2 }
  0x1d   : > { %s364_s16 = scalar_lea.vmem (%p2043_p3), %s2392_s1, %s1682_s15  ;;  %s359_s24 = scalar_lea.vmem (%p2043_p3), [#allocation3], %s1681_s17 }
  0x1e   : > { %v380_v2 = vld [vmem:[%s364_s16] sm:$0x3] (%p2043_p3)  ;;  %v382_v3 = vld [vmem:[%s364_s16 + $0x4] sm:$0x3] (%p2043_p3) }
  0x1f   : > { %381 = vst [vmem:[%s359_s24] sm:$0x3] (%p2043_p3), %v380_v2  ;;  %383 = vst [vmem:[%s359_s24 + $0x2] sm:$0x3] (%p2043_p3), %v382_v3 }
  0x22 PF: > { %s403_s25 = sand.u32 1, %s1936_s11   ;;  %s1684_s26 = sshll.u32 %s1944_s13, 5 }
  0x23   : > { %s1683_s27 = sshll.u32 %s403_s25, 2  ;;  %s2081_s30 = scalar_lea.hbm %s2393_s2, %s1684_s26 }
  0x24   : > { %s407_s16 = scalar_lea.vmem [#allocation4], %s1683_s27  ;;  %s2085_s17 = scalar_lea.sflag [#allocation5], %s403_s25 }
  0x25   : > { %s416_s15 = sshll.u32 %s407_s16, 4  ;;  %s1870_s19 = scalar_lea.hbm %s2081_s30, 64  ;;  %s2083_s15 = int_to_ptr.vmem [resolvable:$true] %s416_s15 }
  0x26   : > { %p1871_p11 = scmp.ne.s32.totalorder %s2081_s30, %s1870_s19  ;;  %s1874_s26 = scalar_lea.hbm %s2393_s2, 128 }
  0x27   : > { %p1875_p0 = scmp.lt.u32.totalorder %s2081_s30, %s2393_s2  ;;  %p1876_p1 = scmp.lt.u32.totalorder %s1874_s26, %s1870_s19 }
  0x28   : > { %p1872_p12 = pnand %p1871_p11, %p2043_p3  ;;  %p1878_p4 = scmp.lt.u32.totalorder %s1870_s19, %s2081_s30 }
  0x29   : > { %p1877_p2 = por %p1876_p1, %p1875_p0 }
  0x2a   : > { %p1873_p13 = pneg %p1872_p12 }
  0x2b   : > { %p1879_p5 = por %p1878_p4, %p1877_p2 }
  0x2d   : > { %p1880_p6 = pnand %p1879_p5, %p1873_p13 }
  0x2f   : > { %1883 = shalt.err (!%p1880_p6)
}
  0x30   : > { %s1884_s25 = scalar_lea.vmem %s2083_s15, 64  ;;  %s1950_s27 = smov [#allocation4]  }
  0x31   : > { %p1885_p7 = scmp.ne.s32.totalorder %s2083_s15, %s1884_s25  ;;  %s1888_s16 = sshll.u32 %s1950_s27, 4  ;;  %s1889_s16 = int_to_ptr.vmem [resolvable:$false] %s1888_s16 }
  0x32   : > { %s1890_s23 = scalar_lea.vmem %s1889_s16, 128  ;;  %p1891_p12 = scmp.lt.s32.totalorder %s2083_s15, %s1889_s16 }
  0x33   : > { %p1886_p10 = pnand %p1885_p7, %p2043_p3  ;;  %p1892_p9 = scmp.lt.s32.totalorder %s1890_s23, %s1884_s25 }
  0x35   : > { %p1887_p11 = pneg %p1886_p10  ;;  %p1893_p0 = por %p1892_p9, %p1891_p12 }
  0x37   : > { %p1894_p1 = pnand %p1893_p0, %p1887_p11 }
  0x39   : > { %1897 = shalt.err (!%p1894_p1)
}
  0x3a   : > { %s1951_s19 = smov 64   ;;  %s1952_s24 = smov 32  }
  0x3b   : > { %s1953_s26 = smov 2  }
  0x3c   : > { %1814 = dma.hbm_to_vmem [thread:$0]  (%p2043_p3), %s2081_s30, 64, %s2083_s15, %s2085_s17, %s1951_s19, %s1952_s24, %s1953_s26  }
  0x3d PF: > { %p1685_p13 = scmp.ge.s32.totalorder %s1948_s14, 1  ;;  %p424_p2 = scmp.lt.s32.totalorder %s1948_s14, 3 }
  0x3f   : > { %p425_p4 = pnand %p1685_p13, %p424_p2 }
  0x40   : > { %s2112_s28 = sand.u32 (!%p425_p4), 1, %s1932_s10  }
  0x41   : > { %428 = sbr.rel (%p425_p4) target bundleno = 599 (0x257), region = 120  ;;  %s1686_s29 = sshll.u32 (!%p425_p4), %s2112_s28, 4 }
  0x42   : > { %s1687_s25 = sshll.u32 (!%p425_p4), %s2112_s28, 2  ;;  %s2118_s18 = scalar_lea.vmem (!%p425_p4), [#allocation2], %s1686_s29 }
  0x43   : > { %s2120_s30 = scalar_lea.vmem (!%p425_p4), [#allocation3], %s1687_s25  ;;  %s445_s15 = scalar_lea.sflag (!%p425_p4), [#allocation5], %s2112_s28 }
  0x44   : > { %s2123_s17 = scalar_lea.vmem (!%p425_p4), [#allocation4], %s1687_s25 }
  0x48   : > { %1923 = dma.done.wait (%p2050_p8), %s445_s15, 64  }
  0x49   : > { %1925 = vsyncadd (%p2050_p8), %s445_s15, 4294967232  ;;  %v1954_v4 = vmov 0.0   ;;  %v525_v5 = vlaneseq  ;;  %vm1955_vm0 = vmmov 0   ;;  %v1956_v6 = vmov 1983009808   ;;  %v2148_v13 = vld [vmem:[%s2118_s18] sm:$0xff] }
  0x4a   : > { %1751 = vmatprep.subr.mxu0 %v1954_v4  ;;  %1762 = vmatprep.subr.mxu1 %v1954_v4  ;;  %v523_v7 = vunpack.c.l.s4 %v1956_v6  ;;  %vm572_vm1 = vcmask 1040384   ;;  %vm573_vm2 = vcmask 1042434   ;;  %vm662_vm3 = vcmask 1043456   ;;  %v1692_v11 = vld [vmem:[%s2394_s3 + $0x4] sm:$0xf]  ;;  %s1708_s15 = sshll.u32 %s1940_s12, 3 }
  0x4b   : > { %1753 = vmatprep.mubr.msk.f32.mxu0 %vm1955_vm0, %v1954_v4  ;;  %1764 = vmatprep.mubr.msk.f32.mxu1 %vm1955_vm0, %v1954_v4  ;;  %v2135_v8 = vshrl.u32 %v525_v5, 7  ;;  %vm512_vm4 = vcmask 1041408   ;;  %vm2137_vm5 = vmor %vm572_vm1, %vm573_vm2  ;;  %v569_v12 = vld [vmem:[%s2394_s3] sm:$0xf]  ;;  %vm575_vm6 = vcmask 1044484   ;;  %v502_v17 = vrot.slane %v2148_v13, 6 }
  0x4c   : > { %v524_v9 = vunpack.c.0.s8 %v523_v7  ;;  %1752 = vmatpush3.msk.msra.mxu0 %vm662_vm3, %v1692_v11  ;;  %1763 = vmatpush3.msk.msra.mxu1 %vm662_vm3, %v569_v12  ;;  %v496_v15 = vld [vmem:[%s2120_s30] sm:$0x3]  ;;  %v498_v16 = vld [vmem:[%s2123_s17] sm:$0x3]  ;;  %v497_v20 = vld [vmem:[%s2120_s30 + $0x2] sm:$0x3] }
  0x4d   : > { %v2159_v18 = vld [vmem:[%s2118_s18 + $0x8] sm:$0xff]  ;;  %1773 = vmatprep.subr.mxu0 %v1954_v4  ;;  %v508_v19 = vrot.slane %v498_v16, 6  ;;  %v513_v22 = vsel %vm512_vm4, %v496_v15, %v502_v17  ;;  %vm577_vm7 = vcmask 1046534   ;;  %vm576_vm8 = vmor %vm2137_vm5, %vm575_vm6  ;;  %vm655_vm9 = vcmask 31744   ;;  %s1709_s27 = sadd.s32 4294967295, %s1708_s15  ;;  %p2414_p3 = scmp.ne.s32.totalorder %s2405_s22, 0 }
  0x4e   : > { %v2151_v14 = vsub.s32 %v524_v9, %v2135_v8  ;;  %v503_v21 = vrot.slane %v2159_v18, 6  ;;  %v499_v23 = vld [vmem:[%s2123_s17 + $0x2] sm:$0x3]  ;;  %v521_v25 = vcombine.high %v513_v22, %v513_v22  ;;  %vm2184_vm10 = vmor %vm576_vm8, %vm577_vm7  ;;  %vm1150_vm1 = vcmask 1046528   ;;  %s489_s17 = scalar_lea.vmem [#allocation6], %s1686_s29  ;;  %s1524_s16 = scalar_lea.vmem (%p2414_p3), %s2400_s9, %s1708_s15 }
  0x4f   : > { %v515_v24 = vsel %vm512_vm4, %v502_v17, %v508_v19  ;;  %v509_v34 = vrot.slane %v499_v23, 6  ;;  %vm1159_vm2 = vcmask 64512  }
  0x50   : > { %v528_v26 = vrot.slane %v513_v22, %v2151_v14  ;;  %v514_v27 = vsel %vm512_vm4, %v497_v20, %v503_v21  ;;  %v2173_v28 = vrot.slane %v515_v24, %v2151_v14  ;;  %v2179_v31 = vrot.slane %v521_v25, %v2151_v14 }
  0x51   : > { %v545_v29 = vcombine.high %v514_v27, %v514_v27  ;;  %v2176_v30 = vrot.slane %v514_v27, %v2151_v14  ;;  %v516_v19 = vsel %vm512_vm4, %v503_v21, %v509_v34  ;;  %vm1318_vm4 = vcmask 1045504  }
  0x52   : > { %v2181_v32 = vcombine.high %v528_v26, %v528_v26  ;;  %v1690_v33 = vrot.slane %v528_v26, 9  ;;  %v590_v36 = vrot.slane %v2173_v28, 7  ;;  %v570_v39 = vcombine.high %v2173_v28, %v2173_v28 }
  0x53   : > { %v2190_v37 = vrot.slane %v545_v29, %v2151_v14  ;;  %v560_v38 = vcombine.high %v2176_v30, %v2176_v30  ;;  %v2198_v40 = vcombine.high %v2179_v31, %v2179_v31  ;;  %v584_v42 = vrot.slane %v2179_v31, 7 }
  0x54   : > { %v581_v41 = vrot.slane %v2181_v32, 7  ;;  %v746_v43 = vcombine.low %v528_v26, %v2181_v32  ;;  %v592_v45 = vrot.slane %v590_v36, 2  ;;  %v593_v46 = vrot.slane %v570_v39, 7  ;;  %v1701_v26 = vld [vmem:[%s2394_s3 + $0x8] sm:$0xf] }
  0x55   : > { %v2205_v44 = vcombine.high %v2190_v37, %v2190_v37  ;;  %v1691_v47 = vrot.slane %v2176_v30, 9  ;;  %v586_v50 = vrot.slane %v584_v42, 2  ;;  %v587_v51 = vrot.slane %v2198_v40, 7 }
  0x56   : > { %v582_v48 = vsel %vm2184_vm10, %v1690_v33, %v581_v41  ;;  %v583_v49 = vrot.slane %v581_v41, 2  ;;  %v747_v52 = vcombine.low %v2179_v31, %v2198_v40  ;;  %v754_v53 = vrot.slane %v746_v43, %v2151_v14 }
  0x57   : > { %v594_v54 = vsel %vm2184_vm10, %v592_v45, %v593_v46  ;;  %v597_v55 = vrot.slane %v560_v38, 7  ;;  %v588_v57 = vsel %vm2184_vm10, %v586_v50, %v587_v51  ;;  %v589_v58 = vrot.slane %v587_v51, 2  ;;  %v1710_v51 = vld [vmem:[%s2396_s5 + $0x8] sm:$0xff] }
  0x58   : > { %v585_v56 = vsel %vm2184_vm10, %v583_v49, %v584_v42  ;;  %v600_v59 = vrot.slane %v2190_v37, 7  ;;  %v761_v61 = vrot.slane %v747_v52, %v2151_v14  ;;  %v603_v2 = vrot.slane %v2205_v44, 7  ;;  %1784 = vmatprep.subr.mxu1 %v1710_v51  ;;  %v2295_v52 = vld [vmem:[%s2396_s5] sm:$0xff] }
  0x59   : > { %v613_v60 = vcombine.low %v582_v48, %v585_v56  ;;  %v598_v62 = vsel %vm2184_vm10, %v1691_v47, %v597_v55  ;;  %v599_v63 = vrot.slane %v597_v55, 2  ;;  %v591_v0 = vsel %vm2184_vm10, %v589_v58, %v590_v36 }
  0x5a   : > { %v602_v1 = vrot.slane %v600_v59, 2  ;;  %v630_v3 = vcombine.low %v594_v54, %v598_v62  ;;  %v614_v5 = vcombine.low %v588_v57, %v591_v0  ;;  %v762_v7 = vcombine.low %v754_v53, %v761_v61 }
  0x5b   : > { %v621_v6 = vrot.slane %v613_v60, %v2151_v14  ;;  %v601_v9 = vsel %vm2184_vm10, %v599_v63, %v600_v59  ;;  %v763_v11 = vcombine.low %v2173_v28, %v2176_v30  ;;  %v764_v12 = vcombine.low %v560_v38, %v2190_v37 }
  0x5c   : > { %v604_v10 = vsel %vm2184_vm10, %v602_v1, %v603_v2  ;;  %v628_v15 = vrot.slane %v614_v5, %v2151_v14  ;;  %1765 = vmatmul.mubr.msk.f32.vlgmr.msra.gmra.mrb[0].mxu1 %vm655_vm9, %v762_v7  ;;  %v638_v17 = vrot.slane %v630_v3, %v2151_v14  ;;  %v568_v23 = vrot.slane %v516_v19, %v2151_v14  ;;  %v1707_v5 = vld [vmem:[%s2395_s4] ss:$0 sm:$0xff] }
  0x5d   : > { %v631_v16 = vcombine.low %v601_v9, %v604_v10  ;;  %1767 = vmatprep.mubr.msk.f32.mxu1 %vm1955_vm0, %v1954_v4  ;;  %v771_v20 = vrot.slane %v763_v11, %v2151_v14  ;;  %v778_v22 = vrot.slane %v764_v12, %v2151_v14  ;;  %v605_v24 = vrot.slane %v603_v2, 2  ;;  %1785 = vmatpush3.msra.mxu1 %v1710_v51 }
  0x5e   : > { %v629_v25 = vcombine.low %v621_v6, %v628_v15  ;;  %v571_v33 = vcombine.high %v568_v23, %v568_v23  ;;  %v606_v21 = vrot.slane %v568_v23, 7  ;;  %v780_v34 = vcombine.low %v2205_v44, %v568_v23  ;;  %1789 = vmatprep.subr.mxu1 %v2295_v52 }
  0x5f   : > { %v645_v27 = vrot.slane %v631_v16, %v2151_v14  ;;  %v779_v29 = vcombine.low %v771_v20, %v778_v22  ;;  %v879_v38 = vcombine.low %v2181_v32, %v2179_v31  ;;  %v880_v39 = vcombine.low %v2198_v40, %v2173_v28 }
  0x60   : > { %1754 = vmatmul.mubr.msk.f32.vlgmr.msra.gmra.mrb[0].mxu0 %vm655_vm9, %v629_v25  ;;  %v607_v41 = vsel %vm2184_vm10, %v605_v24, %v606_v21  ;;  %v608_v42 = vrot.slane %v606_v21, 2  ;;  %v609_v43 = vrot.slane %v571_v33, 7  ;;  %v787_v45 = vrot.slane %v780_v34, %v2151_v14 }
  0x61   : > { %v646_v36 = vcombine.low %v638_v17, %v645_v27  ;;  %1774 = vmatpush3.msk.msra.mxu0 %vm662_vm3, %v1701_v26  ;;  %1756 = vmatprep.mubr.msk.f32.mxu0 %vm1955_vm0, %v1954_v4  ;;  %v1702_v32 = vcombine.high %v2173_v28, %v2176_v30  ;;  %v887_v46 = vrot.slane %v879_v38, %v2151_v14  ;;  %v1075_v9 = vadd.s32 8, %v2135_v8 }
  0x62   : > { %1768 = vmatmul.mubr.msk.f32.gmra.mrb[2].mxu1 %vm655_vm9, %v779_v29  ;;  %v610_v31 = vsel %vm2184_vm10, %v608_v42, %v609_v43  ;;  %v894_v47 = vrot.slane %v880_v39, %v2151_v14  ;;  %v897_v48 = vcombine.low %v2190_v37, %v2205_v44  ;;  %v913_v44 = vcombine.low %v568_v23, %v571_v33 }
  0x63   : > { %1770 = vmatprep.mubr.msk.f32.mxu1 %vm1955_vm0, %v1954_v4  ;;  %v647_v40 = vcombine.low %v607_v41, %v610_v31  ;;  %v904_v30 = vrot.slane %v1702_v32, %v2151_v14  ;;  %v1076_v11 = vstv %s1709_s27 }
  0x64   : > { %1757 = vmatmul.mubr.msk.f32.gmra.mrb[2].mxu0 %vm655_vm9, %v646_v36  ;;  %v895_v28 = vcombine.low %v887_v46, %v894_v47  ;;  %v911_v35 = vrot.slane %v897_v48, %v2151_v14  ;;  %v920_v50 = vrot.slane %v913_v44, %v2151_v14  ;;  %v1078_v19 = vadd.s32 %v1076_v11, %v1075_v9  ;;  %v1719_v9 = vld [vmem:[%s2399_s8] ss:$0 sm:$0xff] }
  0x65   : > { %1759 = vmatprep.mubr.msk.f32.mxu0 %vm1955_vm0, %v1954_v4  ;;  %v654_v49 = vrot.slane %v647_v40, %v2151_v14  ;;  %v1077_v25 = vadd.s32 %v1076_v11, %v2135_v8 }
  0x66   : > { %1771 = vmatmul.mubr.msk.f32.gmra.mrb[4].mxu1 %vm655_vm9, %v787_v45  ;;  %v912_v37 = vcombine.low %v904_v30, %v911_v35  ;;  %vm1080_vm11 = vcmp.ge.s32.totalorder %v1078_v19, 0  ;;  %vm1082_vm12 = vcmp.lt.s32.totalorder %v1078_v19, 16 }
  0x67   : > { %vm1079_vm13 = vcmp.ge.s32.totalorder %v1077_v25, 0  ;;  %vm1081_vm14 = vcmp.lt.s32.totalorder %v1077_v25, 16  ;;  %vm2310_vm15 = vmand %vm1080_vm11, %vm1082_vm12 }
  0x68   : > { %1760 = vmatmul.mubr.msk.f32.gmra.mrb[4].mxu0 %vm655_vm9, %v654_v49 }
  0x69   : > { %1775 = vmatprep.mubr.msk.f32.mxu0 %vm1955_vm0, %v1954_v4 }
  0x6c   : > { %1776 = vmatmul.mubr.msk.f32.vlgmr.msra.gmra.mrb[6].mxu0 %vm655_vm9, %v895_v28 }
  0x6d   : > { %1778 = vmatprep.mubr.msk.f32.mxu0 %vm1955_vm0, %v1954_v4 }
  0x70   : > { %1779 = vmatmul.mubr.msk.f32.gmra.mrb[8].mxu0 %vm655_vm9, %v912_v37 }
  0x71   : > { %1781 = vmatprep.mubr.msk.f32.mxu0 %vm1955_vm0, %v1954_v4  ;;  %vm2318_vm0 = vmand %vm1079_vm13, %vm1081_vm14 }
  0x74   : > { %1782 = vmatmul.mubr.msk.f32.gmra.mrb[10].mxu0 %vm655_vm9, %v920_v50 }
 0x12f   : > { %v863_v53 = vpop.f32.mrb[0].mxu1 }
 0x130   : > { %v1766_v54 = vpop.f32.mrb[1].mxu1 }
 0x133   : > { %v732_v55 = vpop.f32.mrb[0].mxu0 }
 0x134   : > { %v864_v4 = vadd.f32 %v863_v53, %v732_v55  ;;  %v1755_v56 = vpop.f32.mrb[1].mxu0 }
 0x135   : > { %v868_v57 = vpop.f32.mrb[2].mxu1 }
 0x136   : > { %v1769_v58 = vpop.f32.mrb[3].mxu1 }
 0x137   : > { %v737_v59 = vpop.f32.mrb[2].mxu0 }
 0x138   : > { %v869_v60 = vadd.f32 %v868_v57, %v737_v59  ;;  %v1758_v61 = vpop.f32.mrb[3].mxu0 }
 0x139   : > { %v873_v62 = vpop.f32.mrb[4].mxu1 }
 0x13a   : > { %v1772_v63 = vpop.f32.mrb[5].mxu1 }
 0x13b   : > { %v742_v0 = vpop.f32.mrb[4].mxu0 }
 0x13c   : > { %v874_v1 = vadd.f32 %v873_v62, %v742_v0  ;;  %v1761_v2 = vpop.f32.mrb[5].mxu0 }
 0x13f   : > { %v996_v3 = vpop.f32.mrb[6].mxu0 }
 0x140   : > { %v1010_v6 = vadd.f32 %v996_v3, %v864_v4  ;;  %v1777_v7 = vpop.f32.mrb[7].mxu0  ;;  %v1715_v3 = vld [vmem:[%s2396_s5 + $0x10] sm:$0xff] }
 0x142   : > { %v1020_v10 = vadd.f32 %v1707_v5, %v1010_v6  ;;  %v1417_v6 = vld [vmem:[%s2398_s7] sm:$0xf] }
 0x143   : > { %v1001_v12 = vpop.f32.mrb[8].mxu0 }
 0x144   : > { %v1023_v15 = vmax.f32 %v1020_v10, 0.0  ;;  %v1011_v16 = vadd.f32 %v1001_v12, %v869_v60  ;;  %v1780_v17 = vpop.f32.mrb[9].mxu0 }
 0x146   : > { %v1029_v20 = vcombine.high %v1023_v15, %v1023_v15  ;;  %v1036_v22 = vrot.slane %v1023_v15, %v2151_v14  ;;  %v1021_v23 = vadd.f32 %v1707_v5, %v1011_v16 }
 0x147   : > { %v1006_v24 = vpop.f32.mrb[10].mxu0 }
 0x148   : > { %v1043_v26 = vrot.slane %v1029_v20, %v2151_v14  ;;  %v1044_v27 = vcombine.high %v1036_v22, %v1036_v22  ;;  %v1024_v29 = vmax.f32 %v1021_v23, 0.0  ;;  %v1012_v33 = vadd.f32 %v1006_v24, %v874_v1  ;;  %v1783_v21 = vpop.f32.mrb[11].mxu0 }
 0x14a   : > { %v1045_v34 = vcombine.high %v1043_v26, %v1043_v26  ;;  %v1089_v36 = vcombine.low %v1036_v22, %v1044_v27  ;;  %v1046_v38 = vcombine.high %v1024_v29, %v1024_v29  ;;  %v1053_v39 = vrot.slane %v1024_v29, %v2151_v14 }
 0x14b   : > { %v1022_v41 = vadd.f32 %v1707_v5, %v1012_v33 }
 0x14c   : > { %v1090_v42 = vcombine.low %v1043_v26, %v1045_v34  ;;  %v1060_v43 = vrot.slane %v1046_v38, %v2151_v14  ;;  %v1061_v45 = vcombine.high %v1053_v39, %v1053_v39  ;;  %v1112_v31 = vrot.slane %v1053_v39, %v2151_v14 }
 0x14d   : > { %v1025_v32 = vmax.f32 %v1022_v41, 0.0  ;;  %v1097_v40 = vrot.slane %v1089_v36, %v2151_v14 }
 0x14e   : > { %v1104_v46 = vrot.slane %v1090_v42, %v2151_v14  ;;  %v1113_v47 = vcombine.low %v1061_v45, %v1060_v43  ;;  %v1062_v48 = vcombine.high %v1060_v43, %v1060_v43  ;;  %v1142_v30 = vsel %vm2310_vm15, %v1112_v31, 0.0 }
 0x14f   : > { %v1069_v49 = vrot.slane %v1025_v32, %v2151_v14  ;;  %v1152_v53 = vrot.slane %v1142_v30, 1  ;;  %v1320_v54 = vrot.slane %v1142_v30, 2 }
 0x150   : > { %v1105_v35 = vcombine.low %v1097_v40, %v1104_v46  ;;  %v1121_v50 = vrot.slane %v1113_v47, %v2151_v14 }
 0x151   : > { %v1070_v37 = vcombine.high %v1069_v49, %v1069_v49  ;;  %v1114_v44 = vcombine.low %v1062_v48, %v1069_v49 }
 0x152   : > { %v1141_v51 = vsel %vm2318_vm0, %v1105_v35, 0.0 }
 0x153   : > { %v1128_v55 = vrot.slane %v1114_v44, %v2151_v14  ;;  %v1136_v4 = vrot.slane %v1070_v37, %v2151_v14  ;;  %v1151_v56 = vrot.slane %v1141_v51, 1  ;;  %v1319_v57 = vrot.slane %v1141_v51, 2 }
 0x155   : > { %v1129_v58 = vcombine.low %v1121_v50, %v1128_v55  ;;  %v1144_v59 = vsel %vm2310_vm15, %v1136_v4, 0.0  ;;  %v1153_v60 = vsel %vm1150_vm1, %v1151_v56, %v1152_v53  ;;  %v1321_v61 = vsel %vm1318_vm4, %v1319_v57, %v1320_v54 }
 0x156   : > { %1786 = vmatprep.mubr.msk.f32.mxu1 %vm1159_vm2, %v1153_v60  ;;  %v1155_v0 = vrot.slane %v1144_v59, 1  ;;  %v1323_v2 = vrot.slane %v1144_v59, 2 }
 0x157   : > { %v1143_v62 = vsel %vm2318_vm0, %v1129_v58, 0.0 }
 0x158   : > { %v1154_v63 = vrot.slane %v1143_v62, 1  ;;  %v1322_v1 = vrot.slane %v1143_v62, 2 }
 0x15a   : > { %v1156_v14 = vsel %vm1150_vm1, %v1154_v63, %v1155_v0  ;;  %v1324_v5 = vsel %vm1318_vm4, %v1322_v1, %v1323_v2 }
 0x15b   : > { %1787 = vmatmul.mubr.msk.f32.vlgmr.msra.gmra.mrb[6].mxu1 %vm1159_vm2, %v1156_v14 }
 0x15c   : > { %1790 = vmatpush3.msra.mxu1 %v2295_v52  ;;  %1791 = vmatprep.mubr.msk.f32.mxu1 %vm1159_vm2, %v1141_v51  ;;  %v1718_v52 = vld [vmem:[%s2397_s6] ss:$0 sm:$0xff] }
 0x15d   : > { %1794 = vmatprep.subr.mxu1 %v1715_v3 }
 0x163   : > { %1792 = vmatmul.mubr.msk.f32.vlgmr.msra.gmra.mrb[6].mxu1 %vm1159_vm2, %v1143_v62 }
 0x164   : > { %1795 = vmatpush3.msra.mxu1 %v1715_v3  ;;  %1796 = vmatprep.mubr.msk.f32.mxu1 %vm1159_vm2, %v1321_v61 }
 0x165   : > { %1799 = vmatprep.subr.msk.mxu1 %vm662_vm3, %v1417_v6 }
 0x16b   : > { %1797 = vmatmul.mubr.msk.f32.vlgmr.msra.gmra.mrb[6].mxu1 %vm1159_vm2, %v1324_v5 }
 0x16c   : > { %1800 = vmatpush3.msk.msra.mxu1 %vm662_vm3, %v1417_v6  ;;  %1801 = vmatprep.mubr.msk.f32.mxu1 %vm655_vm9, %v2148_v13 }
 0x173   : > { %1802 = vmatmul.mubr.msk.f32.vlgmr.msra.gmra.mrb[6].mxu1 %vm655_vm9, %v2159_v18 }
 0x246   : > { %v1803_v7 = vpop.f32.mrb[6].mxu1 }
 0x247   : > { %v1804_v10 = vadd.f32 %v1803_v7, %v1718_v52  ;;  %v1498_v11 = vpop.f32.mrb[7].mxu1 }
 0x248   : > { %v1806_v12 = vadd.f32 %v1718_v52, %v1498_v11  ;;  %1519 = sbr.rel (!%p2414_p3) target bundleno = 599 (0x257), region = 136 }
 0x249   : > { %v1805_v15 = vadd.f32 %v1804_v10, %v1719_v9 }
 0x24a   : > { %v1807_v16 = vadd.f32 %v1806_v12, %v1719_v9 }
 0x24b   : > { %v1510_v17 = vmax.f32 %v1805_v15, 0.0 }
 0x24c   : > { %v1509_v19 = vmax.f32 %v1807_v16, 0.0 }
 0x24d   : > { %1512 = vst.msk [vmem:[%s489_s17 + $0x8] sm:$0xff] %vm1159_vm2, %v1510_v17 }
 0x24e   : > { %1511 = vst.msk [vmem:[%s489_s17] sm:$0xff] %vm1159_vm2, %v1509_v19 }
 0x254   : > { %v1556_v18 = vld [vmem:[%s489_s17 + $0x8] sm:$0xff] }
 0x255   : > { %v1554_v13 = vld [vmem:[%s489_s17] sm:$0xff]  ;;  %1557 = vst [vmem:[%s1524_s16 + $0x10] sm:$0xff] %v1556_v18 }
 0x256   : > { %1555 = vst [vmem:[%s1524_s16] sm:$0xff] %v1554_v13 }
 0x257 PF: > { %s22_s14 = sadd.s32 1, %s1948_s14   ;;  %s2415_s22 = sld [smem:[#allocation8_spill]] }
 0x258   : > { %p19_p8 = scmp.ge.s32.totalorder %s22_s14, 4   ;;  %s2416_s30 = smov %s1932_s10 }
 0x259   : > { %s2417_s10 = smov %s1936_s11  ;;  %s2418_s11 = smov %s2055_s21 }
 0x25a   : > { %s2419_s12 = smov %s1944_s13  ;;  %21 = sbr.rel (!%p19_p8) target bundleno = 4 (0x4), region = 226 }
 0x25d   : > { %s2420_s13 = smov %s2415_s22 }
 0x261   :  { %1573 = vsyncpa [#allocation5], 1 }
 0x262   :  { %1575 = vsyncpa [#allocation5 + $0x1], 1 }

</bundles_post_ra>
